<compile_context>
chip_gen: v7x
topology: tpu7x:2x2x1
jax: 0.10.0
libtpu: 0.0.40
codegen_flags: <defaults>
</compile_context>

<pallas_src>
import jax
import jax.numpy as jnp
from jax.experimental import pallas as pl
from jax.experimental.pallas import tpu as pltpu


def lstm_cell_kernel(x_ref, hx_ref, cx_ref, w_ref, hy_ref, cy_ref):
    H = cx_ref.shape[1]
    # Single fused MXU matmul: [x || hx] @ W_fused, bf16 operands, f32 acc.
    xh = jnp.concatenate(
        [x_ref[...].astype(jnp.bfloat16), hx_ref[...].astype(jnp.bfloat16)],
        axis=-1)                                                  # [TB, D+H]
    gates = jnp.dot(xh, w_ref[...], preferred_element_type=jnp.float32)

    in_gate = jax.nn.sigmoid(gates[:, 0 * H:1 * H])
    forget_gate = jax.nn.sigmoid(gates[:, 1 * H:2 * H])
    cell_gate = jnp.tanh(gates[:, 2 * H:3 * H])
    out_gate = jax.nn.sigmoid(gates[:, 3 * H:4 * H])

    cy = forget_gate * cx_ref[...] + in_gate * cell_gate
    hy = out_gate * jnp.tanh(cy)

    hy_ref[...] = hy.astype(hy_ref.dtype)
    cy_ref[...] = cy.astype(cy_ref.dtype)


def prepare_lstm_cell_weights(w_ih, w_hh, dtype=jnp.bfloat16):
    """Fuse + pre-transpose module weights ONCE (outside any time-step loop).

    w_ih: [4H, D_in], w_hh: [4H, H] -> [D_in + H, 4H] in `dtype`, so the
    kernel computes gates = [x || hx] @ W_fused with one MXU matmul.
    """
    return jnp.concatenate([w_ih, w_hh], axis=1).T.astype(dtype)


def lstm_cell(inputs, hx, cx, w_fused):
    """inputs: [B, D_in] f32, hx/cx: [B, H] f32, w_fused: [D_in+H, 4H] bf16."""
    B, D_in = inputs.shape
    H = hx.shape[1]
    assert w_fused.shape == (D_in + H, 4 * H)

    # Batch tiling (best perf when D_in and H are multiples of 128).
    tb = 128 if B % 128 == 0 else B
    grid = (B // tb,)

    cost = pl.CostEstimate(
        flops=2 * B * (D_in + H) * 4 * H,
        transcendentals=5 * B * H,
        bytes_accessed=(4 * B * D_in            # x (f32)
                        + 4 * 4 * B * H         # hx, cx, hy, cy (f32)
                        + 2 * (D_in + H) * 4 * H),  # fused weight (bf16)
    )

    hy, cy = pl.pallas_call(
        lstm_cell_kernel,
        out_shape=(
            jax.ShapeDtypeStruct((B, H), hx.dtype),
            jax.ShapeDtypeStruct((B, H), cx.dtype),
        ),
        grid=grid,
        in_specs=[
            pl.BlockSpec((tb, D_in), lambda i: (i, 0)),
            pl.BlockSpec((tb, H), lambda i: (i, 0)),
            pl.BlockSpec((tb, H), lambda i: (i, 0)),
            # Constant index_map -> weights fetched once, VMEM-resident.
            pl.BlockSpec((D_in + H, 4 * H), lambda i: (0, 0)),
        ],
        out_specs=(
            pl.BlockSpec((tb, H), lambda i: (i, 0)),
            pl.BlockSpec((tb, H), lambda i: (i, 0)),
        ),
        input_output_aliases={1: 0, 2: 1},  # hx -> hy, cx -> cy (in-place state)
        compiler_params=pltpu.CompilerParams(
            dimension_semantics=("parallel",),
        ),
        cost_estimate=cost,
    )(inputs, hx, cx, w_fused)
    return hy, cy


def reference_lstm_cell_f32(x, hx, cx, w_ih, w_hh):
    """Exact module semantics in f32."""
    gates = x @ w_ih.T + hx @ w_hh.T
    H = hx.shape[1]
    i = jax.nn.sigmoid(gates[:, :H])
    f = jax.nn.sigmoid(gates[:, H:2 * H])
    g = jnp.tanh(gates[:, 2 * H:3 * H])
    o = jax.nn.sigmoid(gates[:, 3 * H:])
    cy = f * cx + i * g
    hy = o * jnp.tanh(cy)
    return hy, cy


def reference_lstm_cell_bf16(x, hx, cx, w_fused):
    """Same bf16-operand math as the kernel (for a tight tolerance check)."""
    xh = jnp.concatenate([x, hx], axis=1).astype(jnp.bfloat16)
    gates = jnp.dot(xh, w_fused, preferred_element_type=jnp.float32)
    H = hx.shape[1]
    i = jax.nn.sigmoid(gates[:, :H])
    f = jax.nn.sigmoid(gates[:, H:2 * H])
    g = jnp.tanh(gates[:, 2 * H:3 * H])
    o = jax.nn.sigmoid(gates[:, 3 * H:])
    cy = f * cx + i * g
    hy = o * jnp.tanh(cy)
    return hy, cy


if __name__ == "__main__":
    B = 256            # tiled 2 x 128 across the "parallel" batch grid
    input_size = 128   # lane-aligned contraction half
    hidden_size = 128  # multiple of 128 -> lane-dense gates & outputs

    key = jax.random.PRNGKey(0)
    k_x, k_h, k_c, k_wih, k_whh = jax.random.split(key, 5)

    x = jax.random.normal(k_x, (B, input_size), dtype=jnp.float32)
    hx = jax.random.normal(k_h, (B, hidden_size), dtype=jnp.float32)
    cx = jax.random.normal(k_c, (B, hidden_size), dtype=jnp.float32)

    # Matches reset_params: uniform(-sqrt(1/H), sqrt(1/H)); bias=False.
    bound = (1.0 / hidden_size) ** 0.5
    w_ih = jax.random.uniform(
        k_wih, (4 * hidden_size, input_size), minval=-bound, maxval=bound,
        dtype=jnp.float32)
    w_hh = jax.random.uniform(
        k_whh, (4 * hidden_size, hidden_size), minval=-bound, maxval=bound,
        dtype=jnp.float32)

    # Weight fusion/transpose/cast done ONCE, outside the per-step path.
    w_fused = prepare_lstm_cell_weights(w_ih, w_hh)

    # References computed before the kernel call (hx/cx may alias into hy/cy).
    hy_bf16, cy_bf16 = reference_lstm_cell_bf16(x, hx, cx, w_fused)
    hy_f32, cy_f32 = reference_lstm_cell_f32(x, hx, cx, w_ih, w_hh)

    hy, cy = lstm_cell(x, hx, cx, w_fused)
    jax.block_until_ready((hy, cy))

    # Same bf16-operand math as the kernel -> tight tolerance.
    assert jnp.allclose(hy, hy_bf16, atol=2e-3, rtol=2e-3)
    assert jnp.allclose(cy, cy_bf16, atol=2e-3, rtol=2e-3)
    # Full-f32 module semantics -> bf16 matmul operands cost ~1e-2 relative.
    assert jnp.allclose(hy, hy_f32, atol=5e-2, rtol=5e-2)
    assert jnp.allclose(cy, cy_f32, atol=5e-2, rtol=5e-2)

    print("KERNEL_OK")
</pallas_src>

<mosaic_0001>
module attributes {stable_mosaic.version = 11 : i64} {
  func.func @lstm_cell_kernel(%arg0: i32, %arg1: memref<128x128xf32, #tpu.memory_space<vmem>>, %arg2: memref<128x128xf32, #tpu.memory_space<vmem>>, %arg3: memref<128x128xf32, #tpu.memory_space<vmem>>, %arg4: memref<256x512xbf16, #tpu.memory_space<vmem>>, %arg5: memref<128x128xf32, #tpu.memory_space<vmem>>, %arg6: memref<128x128xf32, #tpu.memory_space<vmem>>) attributes {dimension_semantics = [#tpu.dimension_semantics<parallel>], iteration_bounds = array<i64: 2>, scalar_prefetch = 0 : i64, scratch_operands = 0 : i64, tpu.core_type = #tpu.core_type<tc>, window_params = [{transform_indices = @transform_0, window_bounds = array<i64: 128, 128>}, {transform_indices = @transform_1, window_bounds = array<i64: 128, 128>}, {transform_indices = @transform_2, window_bounds = array<i64: 128, 128>}, {pipeline_mode = #tpu.pipeline_mode<synchronous>, transform_indices = @transform_3, window_bounds = array<i64: 256, 512>}, {transform_indices = @transform_4, window_bounds = array<i64: 128, 128>}, {transform_indices = @transform_5, window_bounds = array<i64: 128, 128>}]} {
    %c0 = arith.constant 0 : index
    %c0_0 = arith.constant 0 : index
    %0 = vector.load %arg1[%c0, %c0_0] : memref<128x128xf32, #tpu.memory_space<vmem>>, vector<128x128xf32>
    %1 = arith.truncf %0 : vector<128x128xf32> to vector<128x128xbf16>
    %c0_1 = arith.constant 0 : index
    %c0_2 = arith.constant 0 : index
    %2 = vector.load %arg2[%c0_1, %c0_2] : memref<128x128xf32, #tpu.memory_space<vmem>>, vector<128x128xf32>
    %3 = arith.truncf %2 : vector<128x128xf32> to vector<128x128xbf16>
    %4 = tpu.concatenate %1, %3 in 1 : vector<128x128xbf16>, vector<128x128xbf16> -> vector<128x256xbf16>
    %c0_3 = arith.constant 0 : index
    %c0_4 = arith.constant 0 : index
    %5 = vector.load %arg4[%c0_3, %c0_4] : memref<256x512xbf16, #tpu.memory_space<vmem>>, vector<256x512xbf16>
    %cst = arith.constant dense<0.000000e+00> : vector<128x512xf32>
    %6 = tpu.matmul %4, %5, %cst {dimension_numbers = #tpu.dot_dimension_numbers<[1], [0], [0], [1], [0, 0, 1, 1], [], []>} : vector<128x256xbf16>, vector<256x512xbf16>, vector<128x512xf32> -> vector<128x512xf32>
    %7 = vector.extract_strided_slice %6 {offsets = [0, 0], sizes = [128, 128], strides = [1, 1]} : vector<128x512xf32> to vector<128x128xf32>
    %8 = arith.negf %7 : vector<128x128xf32>
    %9 = math.exp %8 : vector<128x128xf32>
    %cst_5 = arith.constant 1.000000e+00 : f32
    %10 = vector.broadcast %cst_5 : f32 to vector<128x128xf32>
    %11 = arith.addf %10, %9 : vector<128x128xf32>
    %12 = arith.divf %10, %11 : vector<128x128xf32>
    %13 = vector.extract_strided_slice %6 {offsets = [0, 128], sizes = [128, 128], strides = [1, 1]} : vector<128x512xf32> to vector<128x128xf32>
    %14 = arith.negf %13 : vector<128x128xf32>
    %15 = math.exp %14 : vector<128x128xf32>
    %cst_6 = arith.constant 1.000000e+00 : f32
    %16 = vector.broadcast %cst_6 : f32 to vector<128x128xf32>
    %17 = arith.addf %16, %15 : vector<128x128xf32>
    %18 = arith.divf %16, %17 : vector<128x128xf32>
    %19 = vector.extract_strided_slice %6 {offsets = [0, 256], sizes = [128, 128], strides = [1, 1]} : vector<128x512xf32> to vector<128x128xf32>
    %20 = math.tanh %19 : vector<128x128xf32>
    %21 = vector.extract_strided_slice %6 {offsets = [0, 384], sizes = [128, 128], strides = [1, 1]} : vector<128x512xf32> to vector<128x128xf32>
    %22 = arith.negf %21 : vector<128x128xf32>
    %23 = math.exp %22 : vector<128x128xf32>
    %cst_7 = arith.constant 1.000000e+00 : f32
    %24 = vector.broadcast %cst_7 : f32 to vector<128x128xf32>
    %25 = arith.addf %24, %23 : vector<128x128xf32>
    %26 = arith.divf %24, %25 : vector<128x128xf32>
    %c0_8 = arith.constant 0 : index
    %c0_9 = arith.constant 0 : index
    %27 = vector.load %arg3[%c0_8, %c0_9] : memref<128x128xf32, #tpu.memory_space<vmem>>, vector<128x128xf32>
    %28 = arith.mulf %18, %27 : vector<128x128xf32>
    %29 = arith.mulf %12, %20 : vector<128x128xf32>
    %30 = arith.addf %28, %29 : vector<128x128xf32>
    %31 = math.tanh %30 : vector<128x128xf32>
    %32 = arith.mulf %26, %31 : vector<128x128xf32>
    %c0_10 = arith.constant 0 : index
    %c0_11 = arith.constant 0 : index
    %33 = vector.load %arg5[%c0_10, %c0_11] : memref<128x128xf32, #tpu.memory_space<vmem>>, vector<128x128xf32>
    tpu.vector_store %arg5[%c0_10, %c0_11], %32 {strides = array<i32>} : memref<128x128xf32, #tpu.memory_space<vmem>>, vector<128x128xf32>,
    %c0_12 = arith.constant 0 : index
    %c0_13 = arith.constant 0 : index
    %34 = vector.load %arg6[%c0_12, %c0_13] : memref<128x128xf32, #tpu.memory_space<vmem>>, vector<128x128xf32>
    tpu.vector_store %arg6[%c0_12, %c0_13], %30 {strides = array<i32>} : memref<128x128xf32, #tpu.memory_space<vmem>>, vector<128x128xf32>,
    return
  }
  func.func @transform_0(%arg0: i32) -> (i32, i32) {
    %c0_i32 = arith.constant 0 : i32
    %c0_i32_0 = arith.constant 0 : i32
    return %arg0, %c0_i32 : i32, i32
  }
  func.func @transform_1(%arg0: i32) -> (i32, i32) {
    %c0_i32 = arith.constant 0 : i32
    %c0_i32_0 = arith.constant 0 : i32
    return %arg0, %c0_i32 : i32, i32
  }
  func.func @transform_2(%arg0: i32) -> (i32, i32) {
    %c0_i32 = arith.constant 0 : i32
    %c0_i32_0 = arith.constant 0 : i32
    return %arg0, %c0_i32 : i32, i32
  }
  func.func @transform_3(%arg0: i32) -> (i32, i32) {
    %c0_i32 = arith.constant 0 : i32
    %c0_i32_0 = arith.constant 0 : i32
    %c0_i32_1 = arith.constant 0 : i32
    return %c0_i32, %c0_i32_0 : i32, i32
  }
  func.func @transform_4(%arg0: i32) -> (i32, i32) {
    %c0_i32 = arith.constant 0 : i32
    %c0_i32_0 = arith.constant 0 : i32
    return %arg0, %c0_i32 : i32, i32
  }
  func.func @transform_5(%arg0: i32) -> (i32, i32) {
    %c0_i32 = arith.constant 0 : i32
    %c0_i32_0 = arith.constant 0 : i32
    return %arg0, %c0_i32 : i32, i32
  }
}

</mosaic_0001>

<bundles_post_ra>
// kernel: tpu_custom_call.1
= control target key start
LH: loop header
LB: loop body
LE: loop exit
PB: predicated region body
PF: predicated region fallthrough
CT: control target
= control target key end

     0   :  { %11 = vsyncpa [#allocation3], 0  ;;  %s3032_s0 = inlined_call_operand.vmem [shape: f32[256,128], index: 0, kind: input, shape index: {}]   ;;  %s3033_s1 = inlined_call_operand.hbm [shape: f32[256,128], index: 1, kind: input, shape index: {}, may-alias: {1,4}]   ;;  %s3034_s2 = inlined_call_operand.hbm [shape: f32[256,128], index: 2, kind: input, shape index: {}, may-alias: {2,5}]   ;;  %s3035_s3 = inlined_call_operand.vmem [shape: bf16[256,512], index: 3, kind: input, shape index: {}]   ;;  %s3036_s4 = inlined_call_operand.hbm [shape: f32[256,128], index: 4, kind: output, shape index: {0}, may-alias: {1,4}]   ;;  %s3037_s5 = inlined_call_operand.hbm [shape: f32[256,128], index: 5, kind: output, shape index: {1}, may-alias: {2,5}]  }
   0x1   :  { %13 = vsyncpa [#allocation3 + $0x1], 0 }
   0x2   :  { %14 = vsyncpa [#allocation6], 0 }
   0x3   :  { %16 = vsyncpa [#allocation6 + $0x1], 0 }
   0x4   :  { %17 = vsyncpa [#allocation4], 0 }
   0x5   :  { %19 = vsyncpa [#allocation4 + $0x1], 0 }
   0x6   :  { %20 = vsyncpa [#allocation9], 0 }
   0x7   :  { %22 = vsyncpa [#allocation9 + $0x1], 0  ;;  %s2339_s18 = smov 0   ;;  %s2341_s19 = smov 0  }
   0x8   :  { %s2343_s20 = smov 0   ;;  %s2345_s21 = smov 0  }
   0x9 LB: > { %s2360_s22 = sadd.s32 4294967295, %s2299_s21   ;;  %s1585_s23 = sadd.s32 4294967294, %s2299_s21   ;;  %s2299_s21 = sphi %s2345_s21, %s3055_s21   ;;  %s2295_s20 = sphi %s2343_s20, %s3054_s20   ;;  %s2291_s19 = sphi %s2341_s19, %s3053_s19   ;;  %s2287_s18 = sphi %s2339_s18, %s3052_s18  }
   0xa   : > { %s2364_s24 = sadd.s32 1, %s2299_s21   ;;  %s61_s25 = sadd.s32 1, %s2295_s20 }
   0xb   : > { %s58_s26 = ssub.s32 %s2299_s21, %s2364_s24  ;;  %p68_p0 = scmp.ne.s32.totalorder %s2295_s20, %s2291_s19 }
   0xc   : > { %p59_p1 = scmp.eq.s32.totalorder %s58_s26, 0  ;;  %p69_p2 = scmp.eq.s32.totalorder %s2299_s21, 0 }
   0xd   : > { %p74_p3 = scmp.ne.s32.totalorder %s2291_s19, %s2287_s18  ;;  %p75_p4 = scmp.eq.s32.totalorder %s2360_s22, 0 }
   0xe   : > { %s2376_s27 = scalar_select %p59_p1, %s2295_s20, %s61_s25  }
   0xf   : > { %p2378_p5 = por %p69_p2, %p68_p0  ;;  %p2382_p6 = por %p75_p4, %p74_p3 }
  0x10   : > { %p145_p7 = scmp.eq.s32.totalorder %s2360_s22, 1  ;;  %p151_p8 = scmp.eq.s32.totalorder %s1585_s23, 1 }
  0x11   : > { %s3042_s29 = scalar_select %p2382_p6, 1, 0 }
  0x12   : > { %p1747_p10 = scmp.lt.s32.totalorder %s2299_s21, 2  ;;  %p2389_p11 = por %p145_p7, %p68_p0 }
  0x13   : > { %p2393_p12 = por %p151_p8, %p74_p3  ;;  %s2398_s7 = sand.u32 1, %s2295_s20  }
  0x14   : > { %s3043_s30 = scalar_select %p2389_p11, 1, 0 }
  0x15   : > { %s3044_s6 = scalar_select %p2393_p12, 1, 0 }
  0x16   : > { %s1721_s8 = sshll.u32 %s2299_s21, 11  ;;  %s1588_s9 = sshll.u32 %s2398_s7, 7 }
  0x17   : > { %s2407_s12 = scalar_lea.hbm %s3033_s1, %s1721_s8  ;;  %s213_s13 = scalar_lea.vmem [#allocation2], %s1588_s9 }
  0x18   : > { %s220_s14 = sshll.u32 %s213_s13, 4  ;;  %p2413_p13 = pnand %p1747_p10, %p2378_p5  ;;  %s2417_s14 = int_to_ptr.vmem [resolvable:$true] %s220_s14 }
  0x19   : > { %s210_s16 = scalar_lea.sflag [#allocation3], %s2398_s7  ;;  %s2137_s17 = scalar_lea.hbm %s2407_s12, 2048 }
  0x1a   : > { %p2138_p0 = scmp.ne.s32.totalorder %s2407_s12, %s2137_s17  ;;  %p2139_p1 = pneg %p2413_p13 }
  0x1b   : > { %s2142_s26 = scalar_lea.hbm %s3033_s1, 4096  ;;  %p2143_p4 = scmp.lt.u32.totalorder %s2407_s12, %s3033_s1 }
  0x1c   : > { %p2140_p2 = pnand %p2139_p1, %p2138_p0  ;;  %p2144_p5 = scmp.lt.u32.totalorder %s2142_s26, %s2137_s17 }
  0x1d   : > { %p2146_p8 = scmp.lt.u32.totalorder %s2137_s17, %s2407_s12 }
  0x1e   : > { %p2141_p3 = pneg %p2140_p2  ;;  %p2145_p7 = por %p2144_p5, %p2143_p4 }
  0x20   : > { %p2147_p10 = por %p2146_p8, %p2145_p7 }
  0x22   : > { %p2148_p9 = pnand %p2147_p10, %p2141_p3 }
  0x24   : > { %2151 = shalt.err (!%p2148_p9)
}
  0x25   : > { %s2152_s11 = scalar_lea.vmem %s2417_s14, 2048  ;;  %s2301_s13 = smov [#allocation2]  }
  0x26   : > { %p2153_p0 = scmp.ne.s32.totalorder %s2417_s14, %s2152_s11  ;;  %s2157_s23 = sshll.u32 %s2301_s13, 4  ;;  %s2158_s23 = int_to_ptr.vmem [resolvable:$false] %s2157_s23 }
  0x27   : > { %s2159_s25 = scalar_lea.vmem %s2158_s23, 4096  ;;  %p2160_p11 = scmp.lt.s32.totalorder %s2417_s14, %s2158_s23 }
  0x28   : > { %p2155_p2 = pnand %p2153_p0, %p2139_p1  ;;  %p2161_p4 = scmp.lt.s32.totalorder %s2159_s25, %s2152_s11 }
  0x2a   : > { %p2156_p12 = pneg %p2155_p2  ;;  %p2162_p5 = por %p2161_p4, %p2160_p11 }
  0x2c   : > { %p2163_p7 = pnand %p2162_p5, %p2156_p12 }
  0x2e   : > { %2166 = shalt.err (!%p2163_p7)
}
  0x2f   : > { %s3039_s17 = smov 128   ;;  %s2303_s26 = smov 8  }
  0x30   : > { %1736 = dma.hbm_to_vmem [thread:$0]  (!%p2413_p13), %s2407_s12, 2048, %s2417_s14, %s210_s16, %s3039_s17, %s3039_s17, %s2303_s26  }
  0x31   : > { %p1594_p9 = scmp.ge.s32.totalorder %s2299_s21, 1  ;;  %p249_p11 = scmp.lt.s32.totalorder %s2299_s21, 3 }
  0x32   : > { %s2461_s13 = scalar_lea.hbm %s3034_s2, %s1721_s8  ;;  %s234_s23 = scalar_lea.vmem [#allocation5], %s1588_s9 }
  0x33   : > { %p2452_p12 = pnand %p1594_p9, %p249_p11  ;;  %s241_s25 = sshll.u32 %s234_s23, 4  ;;  %s2465_s25 = int_to_ptr.vmem [resolvable:$true] %s241_s25 }
  0x34   : > { %s231_s12 = scalar_lea.sflag [#allocation6], %s2398_s7  ;;  %s2167_s14 = scalar_lea.hbm %s2461_s13, 2048 }
  0x35   : > { %p2168_p3 = scmp.ne.s32.totalorder %s2461_s13, %s2167_s14  ;;  %s2172_s8 = scalar_lea.hbm %s3034_s2, 4096 }
  0x36   : > { %p2173_p0 = scmp.lt.u32.totalorder %s2461_s13, %s3034_s2  ;;  %p2174_p2 = scmp.lt.u32.totalorder %s2172_s8, %s2167_s14 }
  0x37   : > { %p2170_p8 = pnand %p2168_p3, %p2139_p1  ;;  %p2176_p5 = scmp.lt.u32.totalorder %s2167_s14, %s2461_s13 }
  0x38   : > { %p2175_p4 = por %p2174_p2, %p2173_p0 }
  0x39   : > { %p2171_p10 = pneg %p2170_p8 }
  0x3a   : > { %p2177_p7 = por %p2176_p5, %p2175_p4 }
  0x3c   : > { %p2178_p9 = pnand %p2177_p7, %p2171_p10 }
  0x3e   : > { %2181 = shalt.err (!%p2178_p9)
}
  0x3f   : > { %s2182_s9 = scalar_lea.vmem %s2465_s25, 2048  ;;  %s2304_s23 = smov [#allocation5]  }
  0x40   : > { %p2183_p11 = scmp.ne.s32.totalorder %s2465_s25, %s2182_s9  ;;  %s2187_s16 = sshll.u32 %s2304_s23, 4  ;;  %s2188_s16 = int_to_ptr.vmem [resolvable:$false] %s2187_s16 }
  0x41   : > { %s2189_s17 = scalar_lea.vmem %s2188_s16, 4096  ;;  %p2190_p6 = scmp.lt.s32.totalorder %s2465_s25, %s2188_s16 }
  0x42   : > { %p2185_p3 = pnand %p2183_p11, %p2139_p1  ;;  %p2191_p0 = scmp.lt.s32.totalorder %s2189_s17, %s2182_s9 }
  0x44   : > { %p2186_p8 = pneg %p2185_p3  ;;  %p2192_p2 = por %p2191_p0, %p2190_p6 }
  0x46   : > { %p2193_p4 = pnand %p2192_p2, %p2186_p8 }
  0x48   : > { %2196 = shalt.err (!%p2193_p4)
}
  0x49   : > { %s3047_s14 = smov 128   ;;  %253 = sbr.rel (%p2452_p12) target bundleno = 536 (0x218), region = 36 }
  0x4a   : > { %1739 = dma.hbm_to_vmem [thread:$0]  (!%p2413_p13), %s2461_s13, 2048, %s2465_s25, %s231_s12, %s3047_s14, %s3047_s14, %s2303_s26  }
  0x4b   : > { %s2499_s10 = sand.u32 (!%p2452_p12), 1, %s2291_s19   ;;  %p3048_p6 = scmp.ne.s32.totalorder (!%p2452_p12), %s3042_s29, 0 }
  0x4c   : > { %s2502_s8 = sshll.u32 (!%p2452_p12), %s2499_s10, 7  ;;  %s256_s15 = scalar_lea.sflag (!%p2452_p12), [#allocation3], %s2499_s10 }
  0x4d   : > { %s2506_s11 = scalar_lea.vmem (!%p2452_p12), [#allocation2], %s2502_s8 }
  0x50   : > { %2270 = dma.done.wait (%p3048_p6), %s256_s15, 2048  }
  0x51   : > { %2272 = vsyncadd (%p3048_p6), %s256_s15, 4294965248  ;;  %s265_s7 = scalar_lea.sflag [#allocation6], %s2499_s10  ;;  %s2514_s26 = scalar_lea.vmem [#allocation5], %s2502_s8 }
  0x52   : > { %2274 = dma.done.wait (%p3048_p6), %s265_s7, 2048  }
  0x53   : > { %2276 = vsyncadd (%p3048_p6), %s265_s7, 4294965248  ;;  %v1785_v0 = vld [vmem:[%s3035_s3 + $0x4] ss:$16 sps:$4 sm:$0xff]   ;;  %v1787_v1 = vld [vmem:[%s3035_s3] ss:$16 sps:$4 sm:$0xff]   ;;  %s1599_s9 = sshll.u32 %s2360_s22, 4 }
  0x54   : > { %752 = vmatprep.subr.bf16.mxu0 %v1785_v0  ;;  %v1788_v2 = vld [vmem:[%s3035_s3 + $0x24] ss:$16 sps:$4 sm:$0xff]   ;;  %v1790_v3 = vld [vmem:[%s3035_s3 + $0x20] ss:$16 sps:$4 sm:$0xff]   ;;  %v1796_v5 = vld [vmem:[%s3035_s3 + $0xc] ss:$16 sps:$4 sm:$0xff]  }
  0x55   : > { %753 = vmatpush1.bf16.msra.mxu0 %v1787_v1  ;;  %v1791_v4 = vld [vmem:[%s3035_s3 + $0x44] ss:$16 sps:$4 sm:$0xff]   ;;  %v1799_v6 = vld [vmem:[%s3035_s3 + $0x8] ss:$16 sps:$4 sm:$0xff]   ;;  %v1793_v7 = vld [vmem:[%s3035_s3 + $0x40] ss:$16 sps:$4 sm:$0xff]   ;;  %865 = vmatprep.subr.bf16.mxu1 %v1796_v5 }
  0x56   : > { %754 = vmatprep.subr.bf16.mxu0 %v1788_v2  ;;  %v1794_v8 = vld [vmem:[%s3035_s3 + $0x64] ss:$16 sps:$4 sm:$0xff]   ;;  %866 = vmatpush1.bf16.msra.mxu1 %v1799_v6  ;;  %v1802_v9 = vld [vmem:[%s3035_s3 + $0x2c] ss:$16 sps:$4 sm:$0xff]   ;;  %v1805_v10 = vld [vmem:[%s3035_s3 + $0x28] ss:$16 sps:$4 sm:$0xff]  }
  0x57   : > { %867 = vmatprep.subr.bf16.mxu1 %v1802_v9  ;;  %v1798_v11 = vld [vmem:[%s3035_s3 + $0x60] ss:$16 sps:$4 sm:$0xff]   ;;  %v1800_v12 = vld [vmem:[%s3035_s3 + $0x84] ss:$16 sps:$4 sm:$0xff]   ;;  %v1808_v13 = vld [vmem:[%s3035_s3 + $0x4c] ss:$16 sps:$4 sm:$0xff]  }
  0x58   : > { %v1811_v14 = vld [vmem:[%s3035_s3 + $0x48] ss:$16 sps:$4 sm:$0xff]   ;;  %v1814_v15 = vld [vmem:[%s3035_s3 + $0x6c] ss:$16 sps:$4 sm:$0xff]   ;;  %v1804_v16 = vld [vmem:[%s3035_s3 + $0x80] ss:$16 sps:$4 sm:$0xff]  }
  0x59   : > { %755 = vmatpush1.bf16.msra.mxu0 %v1790_v3  ;;  %v1806_v17 = vld [vmem:[%s3035_s3 + $0xa4] ss:$16 sps:$4 sm:$0xff]   ;;  %v1817_v18 = vld [vmem:[%s3035_s3 + $0x68] ss:$16 sps:$4 sm:$0xff]   ;;  %v1820_v19 = vld [vmem:[%s3035_s3 + $0x8c] ss:$16 sps:$4 sm:$0xff]  }
  0x5a   : > { %756 = vmatprep.subr.bf16.mxu0 %v1791_v4  ;;  %868 = vmatpush1.bf16.msra.mxu1 %v1805_v10  ;;  %v1810_v20 = vld [vmem:[%s3035_s3 + $0xa0] ss:$16 sps:$4 sm:$0xff]   ;;  %v1812_v21 = vld [vmem:[%s3035_s3 + $0xc4] ss:$16 sps:$4 sm:$0xff]   ;;  %v1823_v22 = vld [vmem:[%s3035_s3 + $0x88] ss:$16 sps:$4 sm:$0xff]  }
  0x5b   : > { %869 = vmatprep.subr.bf16.mxu1 %v1808_v13  ;;  %v1826_v23 = vld [vmem:[%s3035_s3 + $0xac] ss:$16 sps:$4 sm:$0xff]   ;;  %v1816_v24 = vld [vmem:[%s3035_s3 + $0xc0] ss:$16 sps:$4 sm:$0xff]   ;;  %v1818_v25 = vld [vmem:[%s3035_s3 + $0xe4] ss:$16 sps:$4 sm:$0xff]  }
  0x5c   : > { %v1829_v26 = vld [vmem:[%s3035_s3 + $0xa8] ss:$16 sps:$4 sm:$0xff]   ;;  %v1832_v27 = vld [vmem:[%s3035_s3 + $0xcc] ss:$16 sps:$4 sm:$0xff]   ;;  %v1822_v28 = vld [vmem:[%s3035_s3 + $0xe0] ss:$16 sps:$4 sm:$0xff]  }
  0x5d   : > { %757 = vmatpush1.bf16.msra.mxu0 %v1793_v7  ;;  %v1824_v29 = vld [vmem:[%s3035_s3 + $0x104] ss:$16 sps:$4 sm:$0xff]   ;;  %v1835_v30 = vld [vmem:[%s3035_s3 + $0xc8] ss:$16 sps:$4 sm:$0xff]   ;;  %v1838_v31 = vld [vmem:[%s3035_s3 + $0xec] ss:$16 sps:$4 sm:$0xff]  }
  0x5e   : > { %758 = vmatprep.subr.bf16.mxu0 %v1794_v8  ;;  %870 = vmatpush1.bf16.msra.mxu1 %v1811_v14  ;;  %v1828_v32 = vld [vmem:[%s3035_s3 + $0x100] ss:$16 sps:$4 sm:$0xff]   ;;  %v1830_v33 = vld [vmem:[%s3035_s3 + $0x124] ss:$16 sps:$4 sm:$0xff]   ;;  %v1841_v34 = vld [vmem:[%s3035_s3 + $0xe8] ss:$16 sps:$4 sm:$0xff]  }
  0x5f   : > { %871 = vmatprep.subr.bf16.mxu1 %v1814_v15  ;;  %v1844_v35 = vld [vmem:[%s3035_s3 + $0x10c] ss:$16 sps:$4 sm:$0xff]   ;;  %v1834_v36 = vld [vmem:[%s3035_s3 + $0x120] ss:$16 sps:$4 sm:$0xff]   ;;  %v1836_v37 = vld [vmem:[%s3035_s3 + $0x144] ss:$16 sps:$4 sm:$0xff]  }
  0x60   : > { %v1847_v38 = vld [vmem:[%s3035_s3 + $0x108] ss:$16 sps:$4 sm:$0xff]   ;;  %v1850_v39 = vld [vmem:[%s3035_s3 + $0x12c] ss:$16 sps:$4 sm:$0xff]   ;;  %v344_v40 = vld [vmem:[%s2506_s11] sm:$0xff]  ;;  %p311_p13 = scmp.lt.s32.totalorder %s1599_s9, 31 }
  0x61   : > { %759 = vmatpush1.bf16.msra.mxu0 %v1798_v11  ;;  %v1840_v41 = vld [vmem:[%s3035_s3 + $0x140] ss:$16 sps:$4 sm:$0xff]   ;;  %v1842_v42 = vld [vmem:[%s3035_s3 + $0x164] ss:$16 sps:$4 sm:$0xff]   ;;  %v345_v43 = vld [vmem:[%s2506_s11 + $0x8] sm:$0xff]  ;;  %s1416_s29 = scalar_lea.sflag [#allocation9], %s2499_s10 }
  0x62   : > { %760 = vmatprep.subr.bf16.mxu0 %v1800_v12  ;;  %872 = vmatpush1.bf16.msra.mxu1 %v1817_v18  ;;  %v1853_v44 = vld [vmem:[%s3035_s3 + $0x128] ss:$16 sps:$4 sm:$0xff]   ;;  %v360_v45 = vpack.c.bf16 %v345_v43, %v344_v40  ;;  %v1856_v46 = vld [vmem:[%s3035_s3 + $0x14c] ss:$16 sps:$4 sm:$0xff]   ;;  %v1846_v47 = vld [vmem:[%s3035_s3 + $0x160] ss:$16 sps:$4 sm:$0xff]  }
  0x63   : > { %873 = vmatprep.subr.bf16.mxu1 %v1820_v19  ;;  %v1848_v48 = vld [vmem:[%s3035_s3 + $0x184] ss:$16 sps:$4 sm:$0xff]   ;;  %v1859_v49 = vld [vmem:[%s3035_s3 + $0x148] ss:$16 sps:$4 sm:$0xff]   ;;  %v1862_v50 = vld [vmem:[%s3035_s3 + $0x16c] ss:$16 sps:$4 sm:$0xff]  }
  0x64   : > { %784 = vmatprep.mubr.bf16.mxu0 %v360_v45  ;;  %897 = vmatprep.mubr.bf16.mxu1 %v360_v45  ;;  %v1852_v51 = vld [vmem:[%s3035_s3 + $0x180] ss:$16 sps:$4 sm:$0xff]   ;;  %v1854_v52 = vld [vmem:[%s3035_s3 + $0x1a4] ss:$16 sps:$4 sm:$0xff]   ;;  %v1865_v53 = vld [vmem:[%s3035_s3 + $0x168] ss:$16 sps:$4 sm:$0xff]  }
  0x65   : > { %761 = vmatpush1.bf16.msra.mxu0 %v1804_v16  ;;  %v1868_v54 = vld [vmem:[%s3035_s3 + $0x18c] ss:$16 sps:$4 sm:$0xff]   ;;  %s3057_s9 = smov (!%p311_p13, %s1599_s9), 31  ;;  %v1858_v55 = vld [vmem:[%s3035_s3 + $0x1a0] ss:$16 sps:$4 sm:$0xff]   ;;  %p3049_p12 = scmp.ne.s32.totalorder %s3043_s30, 0 }
  0x66   : > { %762 = vmatprep.subr.bf16.mxu0 %v1806_v17  ;;  %874 = vmatpush1.bf16.msra.mxu1 %v1823_v22  ;;  %v1860_v56 = vld [vmem:[%s3035_s3 + $0x1c4] ss:$16 sps:$4 sm:$0xff]   ;;  %v1871_v57 = vld [vmem:[%s3035_s3 + $0x188] ss:$16 sps:$4 sm:$0xff]   ;;  %s1600_s23 = sshll.u32 %s3057_s9, 3 }
  0x67   : > { %875 = vmatprep.subr.bf16.mxu1 %v1826_v23  ;;  %v1872_v58 = vld [vmem:[%s3035_s3 + $0x1ac] ss:$16 sps:$4 sm:$0xff]   ;;  %v1864_v59 = vld [vmem:[%s3035_s3 + $0x1c0] ss:$16 sps:$4 sm:$0xff]   ;;  %v1866_v60 = vld [vmem:[%s3035_s3 + $0x1e4] ss:$16 sps:$4 sm:$0xff]   ;;  %s2700_s9 = scalar_lea.vmem %s3032_s0, %s1600_s23 }
  0x68   : > { %v1874_v61 = vld [vmem:[%s3035_s3 + $0x1a8] ss:$16 sps:$4 sm:$0xff]   ;;  %v1875_v62 = vld [vmem:[%s3035_s3 + $0x1cc] ss:$16 sps:$4 sm:$0xff]   ;;  %v1870_v63 = vld [vmem:[%s3035_s3 + $0x1e0] ss:$16 sps:$4 sm:$0xff]  }
  0x69   : > { %763 = vmatpush1.bf16.msra.mxu0 %v1810_v20  ;;  %v320_v0 = vld [vmem:[%s2700_s9] sm:$0xff]  ;;  %v321_v1 = vld [vmem:[%s2700_s9 + $0x8] sm:$0xff]  ;;  %v346_v3 = vld [vmem:[%s2506_s11 + $0x10] sm:$0xff]  ;;  %s2305_s23 = smov [#allocation8]  }
  0x6a   : > { %764 = vmatprep.subr.bf16.mxu0 %v1812_v21  ;;  %876 = vmatpush1.bf16.msra.mxu1 %v1829_v26  ;;  %v1877_v2 = vld [vmem:[%s3035_s3 + $0x1c8] ss:$16 sps:$4 sm:$0xff]   ;;  %v1878_v5 = vld [vmem:[%s3035_s3 + $0x1ec] ss:$16 sps:$4 sm:$0xff]   ;;  %v336_v6 = vpack.c.bf16 %v321_v1, %v320_v0  ;;  %v322_v9 = vld [vmem:[%s2700_s9 + $0x10] sm:$0xff]  ;;  %s2201_s15 = sshll.u32 %s2305_s23, 4  ;;  %s2202_s15 = int_to_ptr.vmem [resolvable:$false] %s2201_s15 }
  0x6b   : > { %877 = vmatprep.subr.bf16.mxu1 %v1832_v27  ;;  %v347_v4 = vld [vmem:[%s2506_s11 + $0x18] sm:$0xff]  ;;  %v348_v11 = vld [vmem:[%s2506_s11 + $0x20] sm:$0xff]  ;;  %v349_v12 = vld [vmem:[%s2506_s11 + $0x28] sm:$0xff]  ;;  %s2203_s7 = scalar_lea.vmem %s2202_s15, 4096 }
  0x6c   : > { %v361_v7 = vpack.c.bf16 %v347_v4, %v346_v3  ;;  %v1880_v8 = vld [vmem:[%s3035_s3 + $0x1e8] ss:$16 sps:$4 sm:$0xff]   ;;  %v362_v14 = vpack.c.bf16 %v349_v12, %v348_v11  ;;  %v324_v15 = vld [vmem:[%s2700_s9 + $0x20] sm:$0xff]  ;;  %v350_v17 = vld [vmem:[%s2506_s11 + $0x30] sm:$0xff] }
  0x6d   : > { %765 = vmatpush1.bf16.msra.mxu0 %v1816_v24  ;;  %v323_v10 = vld [vmem:[%s2700_s9 + $0x18] sm:$0xff]  ;;  %v325_v16 = vld [vmem:[%s2700_s9 + $0x28] sm:$0xff]  ;;  %v326_v21 = vld [vmem:[%s2700_s9 + $0x30] sm:$0xff] }
  0x6e   : > { %766 = vmatprep.subr.bf16.mxu0 %v1818_v25  ;;  %878 = vmatpush1.bf16.msra.mxu1 %v1835_v30  ;;  %v337_v13 = vpack.c.bf16 %v323_v10, %v322_v9  ;;  %v351_v18 = vld [vmem:[%s2506_s11 + $0x38] sm:$0xff]  ;;  %v338_v19 = vpack.c.bf16 %v325_v16, %v324_v15  ;;  %v352_v23 = vld [vmem:[%s2506_s11 + $0x40] sm:$0xff]  ;;  %v353_v24 = vld [vmem:[%s2506_s11 + $0x48] sm:$0xff] }
  0x6f   : > { %879 = vmatprep.subr.bf16.mxu1 %v1838_v31  ;;  %v363_v20 = vpack.c.bf16 %v351_v18, %v350_v17  ;;  %v327_v22 = vld [vmem:[%s2700_s9 + $0x38] sm:$0xff]  ;;  %v364_v26 = vpack.c.bf16 %v353_v24, %v352_v23  ;;  %v328_v27 = vld [vmem:[%s2700_s9 + $0x40] sm:$0xff]  ;;  %v333_v40 = vld [vmem:[%s2700_s9 + $0x68] sm:$0xff] }
  0x70   : > { %v339_v25 = vpack.c.bf16 %v327_v22, %v326_v21  ;;  %v355_v30 = vld [vmem:[%s2506_s11 + $0x58] sm:$0xff]  ;;  %v334_v45 = vld [vmem:[%s2700_s9 + $0x70] sm:$0xff] }
  0x71   : > { %767 = vmatpush1.bf16.msra.mxu0 %v1822_v28  ;;  %v329_v28 = vld [vmem:[%s2700_s9 + $0x48] sm:$0xff] }
  0x72   : > { %768 = vmatprep.subr.bf16.mxu0 %v1824_v29  ;;  %880 = vmatpush1.bf16.msra.mxu1 %v1841_v34  ;;  %v354_v29 = vld [vmem:[%s2506_s11 + $0x50] sm:$0xff]  ;;  %v340_v31 = vpack.c.bf16 %v329_v28, %v328_v27  ;;  %v331_v34 = vld [vmem:[%s2700_s9 + $0x58] sm:$0xff] }
  0x73   : > { %881 = vmatprep.subr.bf16.mxu1 %v1844_v35  ;;  %v356_v35 = vld [vmem:[%s2506_s11 + $0x60] sm:$0xff] }
  0x75   : > { %769 = vmatpush1.bf16.msra.mxu0 %v1828_v32  ;;  %v365_v32 = vpack.c.bf16 %v355_v30, %v354_v29 }
  0x76   : > { %770 = vmatprep.subr.bf16.mxu0 %v1830_v33  ;;  %882 = vmatpush1.bf16.msra.mxu1 %v1847_v38  ;;  %v330_v33 = vld [vmem:[%s2700_s9 + $0x50] sm:$0xff] }
  0x77   : > { %883 = vmatprep.subr.bf16.mxu1 %v1850_v39  ;;  %v332_v39 = vld [vmem:[%s2700_s9 + $0x60] sm:$0xff] }
  0x78   : > { %v342_v43 = vpack.c.bf16 %v333_v40, %v332_v39 }
  0x79   : > { %771 = vmatpush1.bf16.msra.mxu0 %v1834_v36  ;;  %v357_v36 = vld [vmem:[%s2506_s11 + $0x68] sm:$0xff] }
  0x7a   : > { %772 = vmatprep.subr.bf16.mxu0 %v1836_v37  ;;  %884 = vmatpush1.bf16.msra.mxu1 %v1853_v44  ;;  %v341_v37 = vpack.c.bf16 %v331_v34, %v330_v33  ;;  %v366_v38 = vpack.c.bf16 %v357_v36, %v356_v35 }
  0x7b   : > { %885 = vmatprep.subr.bf16.mxu1 %v1856_v46  ;;  %v335_v46 = vld [vmem:[%s2700_s9 + $0x78] sm:$0xff]  ;;  %s2812_s9 = scalar_lea.vmem [#allocation7], %s2502_s8 }
  0x7d   : > { %773 = vmatpush1.bf16.msra.mxu0 %v1840_v41  ;;  %v358_v41 = vld [vmem:[%s2506_s11 + $0x70] sm:$0xff] }
  0x7e   : > { %774 = vmatprep.subr.bf16.mxu0 %v1842_v42  ;;  %886 = vmatpush1.bf16.msra.mxu1 %v1859_v49  ;;  %v359_v42 = vld [vmem:[%s2506_s11 + $0x78] sm:$0xff]  ;;  %s2774_s11 = scalar_lea.vmem [#allocation8], %s2502_s8  ;;  %s1723_s8 = sshll.u32 %s2360_s22, 11 }
  0x7f   : > { %887 = vmatprep.subr.bf16.mxu1 %v1862_v50  ;;  %v367_v44 = vpack.c.bf16 %v359_v42, %v358_v41  ;;  %v1282_v42 = vld [vmem:[%s2514_s26] sm:$0xff]  ;;  %s1445_s12 = sshll.u32 %s2774_s11, 4  ;;  %s2940_s17 = scalar_lea.hbm %s3037_s5, %s1723_s8  ;;  %s2943_s12 = int_to_ptr.vmem [resolvable:$true] %s1445_s12 }
  0x80   : > { %s2197_s14 = scalar_lea.vmem %s2943_s12, 2048  ;;  %p2204_p7 = scmp.lt.s32.totalorder %s2943_s12, %s2202_s15 }
  0x81   : > { %775 = vmatpush1.bf16.msra.mxu0 %v1846_v47  ;;  %v343_v47 = vpack.c.bf16 %v335_v46, %v334_v45  ;;  %p2198_p1 = scmp.ne.s32.totalorder %s2943_s12, %s2197_s14  ;;  %p2205_p9 = scmp.lt.s32.totalorder %s2203_s7, %s2197_s14 }
  0x82   : > { %776 = vmatprep.subr.bf16.mxu0 %v1848_v48  ;;  %888 = vmatpush1.bf16.msra.mxu1 %v1865_v53 }
  0x83   : > { %889 = vmatprep.subr.bf16.mxu1 %v1868_v54  ;;  %p2199_p10 = pnand %p2198_p1, %p3049_p12  ;;  %p2206_p11 = por %p2205_p9, %p2204_p7 }
  0x85   : > { %777 = vmatpush1.bf16.msra.mxu0 %v1852_v51  ;;  %p2200_p5 = pneg %p2199_p10 }
  0x86   : > { %778 = vmatprep.subr.bf16.mxu0 %v1854_v52  ;;  %890 = vmatpush1.bf16.msra.mxu1 %v1871_v57 }
  0x87   : > { %891 = vmatprep.subr.bf16.mxu1 %v1872_v58  ;;  %p2207_p3 = pnand %p2206_p11, %p2200_p5 }
  0x89   : > { %779 = vmatpush1.bf16.msra.mxu0 %v1858_v55 }
  0x8a   : > { %780 = vmatprep.subr.bf16.mxu0 %v1860_v56  ;;  %892 = vmatpush1.bf16.msra.mxu1 %v1874_v61 }
  0x8b   : > { %893 = vmatprep.subr.bf16.mxu1 %v1875_v62 }
  0x8d   : > { %781 = vmatpush1.bf16.msra.mxu0 %v1864_v59 }
  0x8e   : > { %782 = vmatprep.subr.bf16.mxu0 %v1866_v60  ;;  %894 = vmatpush1.bf16.msra.mxu1 %v1877_v2 }
  0x8f   : > { %895 = vmatprep.subr.bf16.mxu1 %v1878_v5 }
  0x91   : > { %783 = vmatpush1.bf16.msra.mxu0 %v1870_v63 }
  0x92   : > { %896 = vmatpush1.bf16.msra.mxu1 %v1880_v8 }
  0x94   : > { %785 = vmatmul.mubr.bf16.vlgmr.msra.gmra.mrb[0].mxu0 %v336_v6 }
  0x95   : > { %794 = vmatprep.mubr.bf16.mxu0 %v361_v7  ;;  %898 = vmatmul.mubr.bf16.vlgmr.msra.gmra.mrb[0].mxu1 %v336_v6 }
  0x96   : > { %907 = vmatprep.mubr.bf16.mxu1 %v361_v7 }
  0x9c   : > { %795 = vmatmul.mubr.bf16.gmra.mrb[4].mxu0 %v337_v13 }
  0x9d   : > { %804 = vmatprep.mubr.bf16.mxu0 %v362_v14  ;;  %908 = vmatmul.mubr.bf16.gmra.mrb[4].mxu1 %v337_v13 }
  0x9e   : > { %917 = vmatprep.mubr.bf16.mxu1 %v362_v14 }
  0xa4   : > { %805 = vmatmul.mubr.bf16.gmra.mrb[8].mxu0 %v338_v19 }
  0xa5   : > { %814 = vmatprep.mubr.bf16.mxu0 %v363_v20  ;;  %918 = vmatmul.mubr.bf16.gmra.mrb[8].mxu1 %v338_v19 }
  0xa6   : > { %927 = vmatprep.mubr.bf16.mxu1 %v363_v20 }
  0xac   : > { %815 = vmatmul.mubr.bf16.gmra.mrb[12].mxu0 %v339_v25 }
  0xad   : > { %824 = vmatprep.mubr.bf16.mxu0 %v364_v26  ;;  %928 = vmatmul.mubr.bf16.gmra.mrb[12].mxu1 %v339_v25 }
  0xae   : > { %937 = vmatprep.mubr.bf16.mxu1 %v364_v26 }
  0xb4   : > { %825 = vmatmul.mubr.bf16.gmra.mrb[16].mxu0 %v340_v31 }
  0xb5   : > { %834 = vmatprep.mubr.bf16.mxu0 %v365_v32  ;;  %938 = vmatmul.mubr.bf16.gmra.mrb[16].mxu1 %v340_v31 }
  0xb6   : > { %947 = vmatprep.mubr.bf16.mxu1 %v365_v32 }
  0xbc   : > { %835 = vmatmul.mubr.bf16.gmra.mrb[20].mxu0 %v341_v37 }
  0xbd   : > { %844 = vmatprep.mubr.bf16.mxu0 %v366_v38  ;;  %948 = vmatmul.mubr.bf16.gmra.mrb[20].mxu1 %v341_v37 }
  0xbe   : > { %957 = vmatprep.mubr.bf16.mxu1 %v366_v38 }
  0xc4   : > { %845 = vmatmul.mubr.bf16.gmra.mrb[24].mxu0 %v342_v43 }
  0xc5   : > { %854 = vmatprep.mubr.bf16.mxu0 %v367_v44  ;;  %958 = vmatmul.mubr.bf16.gmra.mrb[24].mxu1 %v342_v43 }
  0xc6   : > { %967 = vmatprep.mubr.bf16.mxu1 %v367_v44 }
  0xcc   : > { %855 = vmatmul.mubr.bf16.gmra.mrb[28].mxu0 %v343_v47 }
  0xcd   : > { %968 = vmatmul.mubr.bf16.gmra.mrb[28].mxu1 %v343_v47 }
 0x167   : > { %v786_v48 = vpop.f32.mrb[0].mxu0 }
 0x168   : > { %v1665_v49 = vmul.f32 -1.442695, %v786_v48  ;;  %v788_v50 = vpop.f32.mrb[1].mxu0  ;;  %v899_v56 = vpop.f32.mrb[0].mxu1 }
 0x169   : > { %v1681_v51 = vmul.f32 -1.442695, %v788_v50  ;;  %v790_v52 = vpop.f32.mrb[2].mxu0  ;;  %v901_v57 = vpop.f32.mrb[1].mxu1  ;;  %v1283_v50 = vld [vmem:[%s2514_s26 + $0x8] sm:$0xff] }
 0x16a   : > { %1881 = vpow2.f32 %v1665_v49  ;;  %v1666_v53 = vmul.f32 -1.442695, %v790_v52  ;;  %v792_v54 = vpop.f32.mrb[3].mxu0  ;;  %v1697_v58 = vmul.f32 -1.442695, %v901_v57  ;;  %v903_v59 = vpop.f32.mrb[2].mxu1 }
 0x16b   : > { %1883 = vpow2.f32 %v1681_v51  ;;  %v1682_v55 = vmul.f32 -1.442695, %v792_v54  ;;  %v905_v61 = vpop.f32.mrb[3].mxu1 }
 0x16c   : > { %1885 = vpow2.f32 %v1666_v53  ;;  %v1698_v4 = vmul.f32 -1.442695, %v905_v61 }
 0x16d   : > { %1887 = vpow2.f32 %v1682_v55 }
 0x16e   : > { %1889 = vtanh.f32 %v899_v56 }
 0x16f   : > { %v796_v60 = vpop.f32.mrb[4].mxu0  ;;  %1891 = vpow2.f32 %v1697_v58 }
 0x170   : > { %v1667_v62 = vmul.f32 -1.442695, %v796_v60  ;;  %v798_v63 = vpop.f32.mrb[5].mxu0  ;;  %1893 = vtanh.f32 %v903_v59  ;;  %v2750_v7 = vpop.f32.mrb[4].mxu1 }
 0x171   : > { %v1683_v0 = vmul.f32 -1.442695, %v798_v63  ;;  %v800_v1 = vpop.f32.mrb[6].mxu0  ;;  %v911_v10 = vpop.f32.mrb[5].mxu1 }
 0x172   : > { %1895 = vpow2.f32 %v1667_v62  ;;  %v1668_v2 = vmul.f32 -1.442695, %v800_v1  ;;  %v802_v3 = vpop.f32.mrb[7].mxu0  ;;  %v2752_v13 = vpop.f32.mrb[6].mxu1  ;;  %v1699_v52 = vmul.f32 -1.442695, %v911_v10 }
 0x173   : > { %1897 = vpow2.f32 %v1683_v0  ;;  %v1684_v5 = vmul.f32 -1.442695, %v802_v3  ;;  %v2754_v17 = vpop.f32.mrb[7].mxu1 }
 0x174   : > { %v1882_v6 = vpop.eup %1881  ;;  %1899 = vpow2.f32 %v1668_v2 }
 0x175   : > { %v1884_v8 = vpop.eup %1883  ;;  %v1026_v9 = vadd.f32 1.0, %v1882_v6  ;;  %1901 = vpow2.f32 %v1684_v5 }
 0x176   : > { %v1886_v11 = vpop.eup %1885  ;;  %v1122_v12 = vadd.f32 1.0, %v1884_v8  ;;  %1903 = vpow2.f32 %v1698_v4 }
 0x177   : > { %v1888_v14 = vpop.eup %1887  ;;  %1905 = vrcp.f32 %v1026_v9  ;;  %v1027_v15 = vadd.f32 1.0, %v1886_v11  ;;  %v806_v16 = vpop.f32.mrb[8].mxu0  ;;  %v1700_v11 = vmul.f32 -1.442695, %v2754_v17 }
 0x178   : > { %1907 = vrcp.f32 %v1122_v12  ;;  %v1123_v18 = vadd.f32 1.0, %v1888_v14  ;;  %v1669_v19 = vmul.f32 -1.442695, %v806_v16  ;;  %v808_v20 = vpop.f32.mrb[9].mxu0  ;;  %v1890_v21 = vpop.eup %1889 }
 0x179   : > { %1909 = vrcp.f32 %v1027_v15  ;;  %v1685_v22 = vmul.f32 -1.442695, %v808_v20  ;;  %v810_v23 = vpop.f32.mrb[10].mxu0  ;;  %v1892_v24 = vpop.eup %1891 }
 0x17a   : > { %1911 = vrcp.f32 %v1123_v18  ;;  %v1670_v25 = vmul.f32 -1.442695, %v810_v23  ;;  %v812_v26 = vpop.f32.mrb[11].mxu0  ;;  %v1894_v27 = vpop.eup %1893  ;;  %v1234_v28 = vadd.f32 1.0, %v1892_v24 }
 0x17b   : > { %1913 = vpow2.f32 %v1669_v19  ;;  %v2756_v30 = vpop.f32.mrb[8].mxu1  ;;  %v1686_v44 = vmul.f32 -1.442695, %v812_v26  ;;  %v1284_v19 = vld [vmem:[%s2514_s26 + $0x10] sm:$0xff] }
 0x17c   : > { %v1896_v29 = vpop.eup %1895  ;;  %1915 = vpow2.f32 %v1685_v22  ;;  %v2758_v33 = vpop.f32.mrb[9].mxu1 }
 0x17d   : > { %v1898_v31 = vpop.eup %1897  ;;  %v1028_v32 = vadd.f32 1.0, %v1896_v29  ;;  %1917 = vrcp.f32 %v1234_v28  ;;  %v2760_v36 = vpop.f32.mrb[10].mxu1 }
 0x17e   : > { %v1900_v34 = vpop.eup %1899  ;;  %v1124_v35 = vadd.f32 1.0, %v1898_v31  ;;  %1919 = vpow2.f32 %v1670_v25  ;;  %v2762_v40 = vpop.f32.mrb[11].mxu1 }
 0x17f   : > { %v1902_v37 = vpop.eup %1901  ;;  %1921 = vrcp.f32 %v1028_v32  ;;  %v1029_v38 = vadd.f32 1.0, %v1900_v34  ;;  %v816_v39 = vpop.f32.mrb[12].mxu0 }
 0x180   : > { %v1904_v41 = vpop.eup %1903  ;;  %1923 = vrcp.f32 %v1124_v35  ;;  %v1125_v43 = vadd.f32 1.0, %v1902_v37  ;;  %v818_v45 = vpop.f32.mrb[13].mxu0  ;;  %v1671_v15 = vmul.f32 -1.442695, %v816_v39 }
 0x181   : > { %v1906_v46 = vpop.eup %1905  ;;  %1925 = vrcp.f32 %v1029_v38  ;;  %v1235_v47 = vadd.f32 1.0, %v1904_v41  ;;  %v820_v48 = vpop.f32.mrb[14].mxu0  ;;  %v1687_v20 = vmul.f32 -1.442695, %v818_v45 }
 0x182   : > { %v1908_v49 = vpop.eup %1907  ;;  %1927 = vrcp.f32 %v1125_v43  ;;  %v1314_v51 = vmul.f32 %v1906_v46, %v1890_v21  ;;  %v822_v53 = vpop.f32.mrb[15].mxu0  ;;  %v1672_v22 = vmul.f32 -1.442695, %v820_v48  ;;  %v1285_v43 = vld [vmem:[%s2514_s26 + $0x18] sm:$0xff]  ;;  %v1701_v46 = vmul.f32 -1.442695, %v2758_v33 }
 0x183   : > { %v1910_v54 = vpop.eup %1909  ;;  %v1298_v55 = vmul.f32 %v1908_v49, %v1282_v42  ;;  %1929 = vrcp.f32 %v1235_v47  ;;  %v2766_v58 = vpop.f32.mrb[12].mxu1 }
 0x184   : > { %v1912_v56 = vpop.eup %1911  ;;  %v1315_v57 = vmul.f32 %v1910_v54, %v1894_v27  ;;  %1931 = vpow2.f32 %v1686_v44  ;;  %v2769_v62 = vpop.f32.mrb[13].mxu1  ;;  %v1688_v27 = vmul.f32 -1.442695, %v822_v53 }
 0x185   : > { %v1914_v59 = vpop.eup %1913  ;;  %v1299_v60 = vmul.f32 %v1912_v56, %v1283_v50  ;;  %v1330_v61 = vadd.f32 %v1314_v51, %v1298_v55  ;;  %1933 = vtanh.f32 %v2750_v7  ;;  %v2771_v1 = vpop.f32.mrb[14].mxu1  ;;  %v1702_v51 = vmul.f32 -1.442695, %v2762_v40 }
 0x186   : > { %v1916_v63 = vpop.eup %1915  ;;  %v1030_v0 = vadd.f32 1.0, %v1914_v59  ;;  %1935 = vpow2.f32 %v1699_v52  ;;  %v2779_v6 = vpop.f32.mrb[15].mxu1 }
 0x187   : > { %v1918_v2 = vpop.eup %1917  ;;  %1937 = vtanh.f32 %v1330_v61  ;;  %1394 = vst [vmem:[%s2774_s11] sm:$0xff] %v1330_v61  ;;  %v1331_v3 = vadd.f32 %v1315_v57, %v1299_v60  ;;  %v1126_v4 = vadd.f32 1.0, %v1916_v63  ;;  %v2777_v5 = vpop.f32.mrb[16].mxu0 }
 0x188   : > { %v1920_v7 = vpop.eup %1919  ;;  %1939 = vrcp.f32 %v1030_v0  ;;  %v2781_v8 = vpop.f32.mrb[17].mxu0  ;;  %v1673_v54 = vmul.f32 -1.442695, %v2777_v5 }
 0x189   : > { %v1922_v9 = vpop.eup %1921  ;;  %1941 = vtanh.f32 %v1331_v3  ;;  %1395 = vst [vmem:[%s2774_s11 + $0x8] sm:$0xff] %v1331_v3  ;;  %v1031_v10 = vadd.f32 1.0, %v1920_v7  ;;  %v2785_v12 = vpop.f32.mrb[18].mxu0 }
 0x18a   : > { %v1924_v14 = vpop.eup %1923  ;;  %1943 = vrcp.f32 %v1126_v4  ;;  %v2787_v16 = vpop.f32.mrb[19].mxu0 }
 0x18b   : > { %v1926_v18 = vpop.eup %1925  ;;  %1945 = vrcp.f32 %v1031_v10  ;;  %v2791_v23 = vpop.f32.mrb[16].mxu1  ;;  %v1300_v26 = vmul.f32 %v1924_v14, %v1284_v19 }
 0x18c   : > { %v1928_v21 = vpop.eup %1927  ;;  %1947 = vtanh.f32 %v2752_v13  ;;  %v2793_v17 = vpop.f32.mrb[17].mxu1 }
 0x18d   : > { %v1930_v24 = vpop.eup %1929  ;;  %1949 = vpow2.f32 %v1700_v11  ;;  %v2795_v28 = vpop.f32.mrb[18].mxu1  ;;  %v1301_v33 = vmul.f32 %v1928_v21, %v1285_v43  ;;  %v1286_v11 = vld [vmem:[%s2514_s26 + $0x20] sm:$0xff]  ;;  %v1287_v21 = vld [vmem:[%s2514_s26 + $0x28] sm:$0xff] }
 0x18e   : > { %v1932_v25 = vpop.eup %1931  ;;  %1951 = vpow2.f32 %v1671_v15  ;;  %v2799_v13 = vpop.f32.mrb[19].mxu1 }
 0x18f   : > { %v1934_v29 = vpop.eup %1933  ;;  %v1127_v31 = vadd.f32 1.0, %v1932_v25  ;;  %1953 = vpow2.f32 %v1687_v20  ;;  %v2797_v32 = vpop.f32.mrb[20].mxu0 }
 0x190   : > { %v1936_v34 = vpop.eup %1935  ;;  %v1316_v35 = vmul.f32 %v1934_v29, %v1922_v9  ;;  %1955 = vpow2.f32 %v1672_v22  ;;  %v2801_v37 = vpop.f32.mrb[21].mxu0  ;;  %v1690_v29 = vmul.f32 -1.442695, %v2787_v16 }
 0x191   : > { %v1938_v38 = vpop.eup %1937  ;;  %1957 = vrcp.f32 %v1127_v31  ;;  %v1236_v39 = vadd.f32 1.0, %v1936_v34  ;;  %v2803_v41 = vpop.f32.mrb[22].mxu0 }
 0x192   : > { %v2805_v42 = vpop.eup %1939  ;;  %v1362_v44 = vmul.f32 %v1938_v38, %v1918_v2  ;;  %v1332_v45 = vadd.f32 %v1316_v35, %v1300_v26  ;;  %1959 = vpow2.f32 %v1688_v27  ;;  %v2809_v47 = vpop.f32.mrb[23].mxu0 }
 0x193   : > { %v1942_v48 = vpop.eup %1941  ;;  %1961 = vrcp.f32 %v1236_v39  ;;  %v2817_v52 = vpop.f32.mrb[20].mxu1 }
 0x194   : > { %v1944_v49 = vpop.eup %1943  ;;  %1378 = vst [vmem:[%s2812_s9] sm:$0xff] %v1362_v44  ;;  %v1363_v50 = vmul.f32 %v1942_v48, %v1930_v24  ;;  %1963 = vtanh.f32 %v1332_v45  ;;  %1396 = vst [vmem:[%s2774_s11 + $0x10] sm:$0xff] %v1332_v45  ;;  %v2823_v55 = vpop.f32.mrb[21].mxu1  ;;  %v1674_v24 = vmul.f32 -1.442695, %v2785_v12 }
 0x195   : > { %v2819_v53 = vpop.eup %1945  ;;  %1965 = vtanh.f32 %v2756_v30  ;;  %v2826_v57 = vpop.f32.mrb[22].mxu1  ;;  %v1302_v27 = vmul.f32 %v1944_v49, %v1286_v11 }
 0x196   : > { %v1948_v56 = vpop.eup %1947  ;;  %1379 = vst [vmem:[%s2812_s9 + $0x8] sm:$0xff] %v1363_v50  ;;  %1967 = vpow2.f32 %v1701_v46  ;;  %v2831_v61 = vpop.f32.mrb[23].mxu1 }
 0x197   : > { %v1950_v59 = vpop.eup %1949  ;;  %v1317_v60 = vmul.f32 %v1948_v56, %v1926_v18  ;;  %1969 = vtanh.f32 %v2760_v36  ;;  %v2829_v40 = vpop.f32.mrb[24].mxu0  ;;  %v1689_v18 = vmul.f32 -1.442695, %v2781_v8 }
 0x198   : > { %v1952_v63 = vpop.eup %1951  ;;  %v1237_v30 = vadd.f32 1.0, %v1950_v59  ;;  %1971 = vpow2.f32 %v1702_v51  ;;  %v2833_v0 = vpop.f32.mrb[25].mxu0 }
 0x199   : > { %v1954_v2 = vpop.eup %1953  ;;  %v1333_v3 = vadd.f32 %v1317_v60, %v1301_v33  ;;  %v1032_v4 = vadd.f32 1.0, %v1952_v63  ;;  %1973 = vpow2.f32 %v1673_v54  ;;  %v2835_v5 = vpop.f32.mrb[26].mxu0 }
 0x19a   : > { %v1956_v7 = vpop.eup %1955  ;;  %1975 = vrcp.f32 %v1237_v30  ;;  %v1128_v36 = vadd.f32 1.0, %v1954_v2  ;;  %v2837_v9 = vpop.f32.mrb[27].mxu0  ;;  %v1703_v30 = vmul.f32 -1.442695, %v2769_v62  ;;  %v1675_v62 = vmul.f32 -1.442695, %v2797_v32 }
 0x19b   : > { %v1958_v10 = vpop.eup %1957  ;;  %1977 = vtanh.f32 %v1333_v3  ;;  %1397 = vst [vmem:[%s2774_s11 + $0x18] sm:$0xff] %v1333_v3  ;;  %v1033_v14 = vadd.f32 1.0, %v1956_v7  ;;  %v2842_v19 = vpop.f32.mrb[24].mxu1  ;;  %v1676_v32 = vmul.f32 -1.442695, %v2803_v41 }
 0x19c   : > { %v1960_v15 = vpop.eup %1959  ;;  %1979 = vrcp.f32 %v1032_v4  ;;  %v2846_v25 = vpop.f32.mrb[25].mxu1  ;;  %v1303_v43 = vmul.f32 %v1958_v10, %v1287_v21 }
 0x19d   : > { %v1962_v20 = vpop.eup %1961  ;;  %1981 = vrcp.f32 %v1128_v36  ;;  %v1129_v22 = vadd.f32 1.0, %v1960_v15  ;;  %v2849_v31 = vpop.f32.mrb[26].mxu1  ;;  %v1704_v36 = vmul.f32 -1.442695, %v2779_v6 }
 0x19e   : > { %v1964_v26 = vpop.eup %1963  ;;  %1983 = vrcp.f32 %v1033_v14  ;;  %v2853_v38 = vpop.f32.mrb[27].mxu1 }
 0x19f   : > { %v1966_v34 = vpop.eup %1965  ;;  %v1364_v8 = vmul.f32 %v1964_v26, %v1962_v20  ;;  %1985 = vrcp.f32 %v1129_v22  ;;  %v2851_v35 = vpop.f32.mrb[28].mxu0  ;;  %v1691_v22 = vmul.f32 -1.442695, %v2801_v37  ;;  %v1705_v37 = vmul.f32 -1.442695, %v2793_v17 }
 0x1a0   : > { %v1968_v39 = vpop.eup %1967  ;;  %v1318_v12 = vmul.f32 %v1966_v34, %v2805_v42  ;;  %1987 = vpow2.f32 %v1689_v18  ;;  %v2856_v44 = vpop.f32.mrb[29].mxu0 }
 0x1a1   : > { %v1970_v45 = vpop.eup %1969  ;;  %1380 = vst [vmem:[%s2812_s9 + $0x10] sm:$0xff] %v1364_v8  ;;  %v1238_v16 = vadd.f32 1.0, %v1968_v39  ;;  %1989 = vpow2.f32 %v1674_v24  ;;  %v2859_v46 = vpop.f32.mrb[30].mxu0  ;;  %v1289_v39 = vld [vmem:[%s2514_s26 + $0x38] sm:$0xff] }
 0x1a2   : > { %v1972_v48 = vpop.eup %1971  ;;  %v1334_v49 = vadd.f32 %v1318_v12, %v1302_v27  ;;  %v1319_v50 = vmul.f32 %v1970_v45, %v2819_v53  ;;  %1991 = vpow2.f32 %v1690_v29  ;;  %v2862_v51 = vpop.f32.mrb[31].mxu0  ;;  %v1288_v27 = vld [vmem:[%s2514_s26 + $0x30] sm:$0xff] }
 0x1a3   : > { %v1974_v33 = vpop.eup %1973  ;;  %1993 = vrcp.f32 %v1238_v16  ;;  %v1239_v42 = vadd.f32 1.0, %v1972_v48  ;;  %v2865_v60 = vpop.f32.mrb[28].mxu1 }
 0x1a4   : > { %v1976_v54 = vpop.eup %1975  ;;  %1995 = vtanh.f32 %v1334_v49  ;;  %1398 = vst [vmem:[%s2774_s11 + $0x20] sm:$0xff] %v1334_v49  ;;  %v1335_v56 = vadd.f32 %v1319_v50, %v1303_v43  ;;  %v1034_v59 = vadd.f32 1.0, %v1974_v33  ;;  %v2868_v53 = vpop.f32.mrb[29].mxu1 }
 0x1a5   : > { %v1978_v63 = vpop.eup %1977  ;;  %1997 = vrcp.f32 %v1239_v42  ;;  %v2871_v4 = vpop.f32.mrb[30].mxu1 }
 0x1a6   : > { %v1980_v2 = vpop.eup %1979  ;;  %v1365_v3 = vmul.f32 %v1978_v63, %v1976_v54  ;;  %1999 = vtanh.f32 %v1335_v56  ;;  %1399 = vst [vmem:[%s2774_s11 + $0x28] sm:$0xff] %v1335_v56  ;;  %v2874_v10 = vpop.f32.mrb[31].mxu1 }
 0x1a7   : > { %v1982_v7 = vpop.eup %1981  ;;  %2001 = vrcp.f32 %v1034_v59 }
 0x1a8   : > { %v1984_v11 = vpop.eup %1983  ;;  %1381 = vst [vmem:[%s2812_s9 + $0x18] sm:$0xff] %v1365_v3  ;;  %2003 = vtanh.f32 %v2766_v58  ;;  %v1304_v12 = vmul.f32 %v1982_v7, %v1288_v27  ;;  %v1677_v3 = vmul.f32 -1.442695, %v2829_v40 }
 0x1a9   : > { %v1986_v14 = vpop.eup %1985  ;;  %2005 = vpow2.f32 %v1703_v30 }
 0x1aa   : > { %v1988_v15 = vpop.eup %1987  ;;  %2007 = vtanh.f32 %v2771_v1  ;;  %v1692_v1 = vmul.f32 -1.442695, %v2809_v47  ;;  %v1305_v48 = vmul.f32 %v1986_v14, %v1289_v39 }
 0x1ab   : > { %v1990_v18 = vpop.eup %1989  ;;  %v1130_v20 = vadd.f32 1.0, %v1988_v15  ;;  %2009 = vpow2.f32 %v1704_v36  ;;  %v1290_v36 = vld [vmem:[%s2514_s26 + $0x40] sm:$0xff] }
 0x1ac   : > { %v1992_v21 = vpop.eup %1991  ;;  %v1035_v6 = vadd.f32 1.0, %v1990_v18  ;;  %2011 = vpow2.f32 %v1675_v62  ;;  %v1291_v62 = vld [vmem:[%s2514_s26 + $0x48] sm:$0xff] }
 0x1ad   : > { %v1994_v24 = vpop.eup %1993  ;;  %2013 = vrcp.f32 %v1130_v20  ;;  %v1131_v58 = vadd.f32 1.0, %v1992_v21 }
 0x1ae   : > { %v1996_v26 = vpop.eup %1995  ;;  %2015 = vrcp.f32 %v1035_v6 }
 0x1af   : > { %v1998_v29 = vpop.eup %1997  ;;  %v1366_v34 = vmul.f32 %v1996_v26, %v1994_v24  ;;  %2017 = vrcp.f32 %v1131_v58  ;;  %v1678_v26 = vmul.f32 -1.442695, %v2835_v5  ;;  %v1707_v5 = vmul.f32 -1.442695, %v2823_v55 }
 0x1b0   : > { %v2000_v8 = vpop.eup %1999  ;;  %2019 = vpow2.f32 %v1691_v22  ;;  %v1679_v55 = vmul.f32 -1.442695, %v2851_v35  ;;  %v1696_v35 = vmul.f32 -1.442695, %v2862_v51  ;;  %v1709_v51 = vmul.f32 -1.442695, %v2846_v25 }
 0x1b1   : > { %v2002_v43 = vpop.eup %2001  ;;  %1382 = vst [vmem:[%s2812_s9 + $0x20] sm:$0xff] %v1366_v34  ;;  %v1367_v45 = vmul.f32 %v2000_v8, %v1998_v29  ;;  %2021 = vpow2.f32 %v1676_v32  ;;  %v1694_v34 = vmul.f32 -1.442695, %v2837_v9 }
 0x1b2   : > { %v2004_v41 = vpop.eup %2003  ;;  %2023 = vpow2.f32 %v1692_v1 }
 0x1b3   : > { %v2006_v16 = vpop.eup %2005  ;;  %1383 = vst [vmem:[%s2812_s9 + $0x28] sm:$0xff] %v1367_v45  ;;  %v1320_v47 = vmul.f32 %v2004_v41, %v1980_v2  ;;  %2025 = vtanh.f32 %v2791_v23  ;;  %v1706_v23 = vmul.f32 -1.442695, %v2799_v13  ;;  %v1693_v13 = vmul.f32 -1.442695, %v2833_v0 }
 0x1b4   : > { %v2008_v49 = vpop.eup %2007  ;;  %v1240_v50 = vadd.f32 1.0, %v2006_v16  ;;  %2027 = vpow2.f32 %v1705_v37 }
 0x1b5   : > { %v2010_v33 = vpop.eup %2009  ;;  %v1336_v42 = vadd.f32 %v1320_v47, %v1304_v12  ;;  %v1321_v17 = vmul.f32 %v2008_v49, %v1984_v11  ;;  %2029 = vtanh.f32 %v2795_v28  ;;  %v1708_v49 = vmul.f32 -1.442695, %v2831_v61  ;;  %v1292_v61 = vld [vmem:[%s2514_s26 + $0x50] sm:$0xff] }
 0x1b6   : > { %v2012_v54 = vpop.eup %2011  ;;  %2031 = vrcp.f32 %v1240_v50  ;;  %v1241_v56 = vadd.f32 1.0, %v2010_v33 }
 0x1b7   : > { %v2014_v59 = vpop.eup %2013  ;;  %2033 = vtanh.f32 %v1336_v42  ;;  %1400 = vst [vmem:[%s2774_s11 + $0x30] sm:$0xff] %v1336_v42  ;;  %v1337_v63 = vadd.f32 %v1321_v17, %v1305_v48  ;;  %v1036_v30 = vadd.f32 1.0, %v2012_v54  ;;  %v1695_v17 = vmul.f32 -1.442695, %v2856_v44 }
 0x1b8   : > { %v2016_v2 = vpop.eup %2015  ;;  %2035 = vrcp.f32 %v1241_v56  ;;  %v1306_v18 = vmul.f32 %v2014_v59, %v1290_v36  ;;  %v1680_v56 = vmul.f32 -1.442695, %v2859_v46 }
 0x1b9   : > { %v2018_v7 = vpop.eup %2017  ;;  %2037 = vtanh.f32 %v1337_v63  ;;  %1401 = vst [vmem:[%s2774_s11 + $0x38] sm:$0xff] %v1337_v63 }
 0x1ba   : > { %v2020_v28 = vpop.eup %2019  ;;  %2039 = vrcp.f32 %v1036_v30  ;;  %v1307_v22 = vmul.f32 %v2018_v7, %v1291_v62  ;;  %v1293_v7 = vld [vmem:[%s2514_s26 + $0x58] sm:$0xff] }
 0x1bb   : > { %v2022_v11 = vpop.eup %2021  ;;  %v1132_v14 = vadd.f32 1.0, %v2020_v28  ;;  %2041 = vpow2.f32 %v1706_v23 }
 0x1bc   : > { %v2024_v15 = vpop.eup %2023  ;;  %v1037_v20 = vadd.f32 1.0, %v2022_v11  ;;  %2043 = vpow2.f32 %v1677_v3 }
 0x1bd   : > { %v2026_v21 = vpop.eup %2025  ;;  %2045 = vrcp.f32 %v1132_v14  ;;  %v1133_v6 = vadd.f32 1.0, %v2024_v15 }
 0x1be   : > { %v2028_v40 = vpop.eup %2027  ;;  %2047 = vrcp.f32 %v1037_v20  ;;  %v1322_v24 = vmul.f32 %v2026_v21, %v2002_v43 }
 0x1bf   : > { %v2030_v58 = vpop.eup %2029  ;;  %2049 = vrcp.f32 %v1133_v6  ;;  %v1242_v32 = vadd.f32 1.0, %v2028_v40 }
 0x1c0   : > { %v2032_v27 = vpop.eup %2031  ;;  %v1338_v1 = vadd.f32 %v1322_v24, %v1306_v18  ;;  %v1323_v29 = vmul.f32 %v2030_v58, %v2016_v2  ;;  %2051 = vpow2.f32 %v1693_v13 }
 0x1c1   : > { %v2034_v0 = vpop.eup %2033  ;;  %2053 = vrcp.f32 %v1242_v32 }
 0x1c2   : > { %v2036_v8 = vpop.eup %2035  ;;  %v1368_v39 = vmul.f32 %v2034_v0, %v2032_v27  ;;  %2055 = vtanh.f32 %v1338_v1  ;;  %1402 = vst [vmem:[%s2774_s11 + $0x40] sm:$0xff] %v1338_v1  ;;  %v1339_v37 = vadd.f32 %v1323_v29, %v1307_v22  ;;  %v1710_v1 = vmul.f32 -1.442695, %v2853_v38 }
 0x1c3   : > { %v2038_v43 = vpop.eup %2037  ;;  %2057 = vpow2.f32 %v1678_v26  ;;  %v1294_v26 = vld [vmem:[%s2514_s26 + $0x60] sm:$0xff] }
 0x1c4   : > { %v2040_v12 = vpop.eup %2039  ;;  %1384 = vst [vmem:[%s2812_s9 + $0x30] sm:$0xff] %v1368_v39  ;;  %v1369_v45 = vmul.f32 %v2038_v43, %v2036_v8  ;;  %2059 = vtanh.f32 %v1339_v37  ;;  %1403 = vst [vmem:[%s2774_s11 + $0x48] sm:$0xff] %v1339_v37 }
 0x1c5   : > { %v2042_v41 = vpop.eup %2041  ;;  %2061 = vpow2.f32 %v1694_v34 }
 0x1c6   : > { %v2044_v16 = vpop.eup %2043  ;;  %1385 = vst [vmem:[%s2812_s9 + $0x38] sm:$0xff] %v1369_v45  ;;  %v1243_v9 = vadd.f32 1.0, %v2042_v41  ;;  %2063 = vtanh.f32 %v2817_v52  ;;  %v1712_v41 = vmul.f32 -1.442695, %v2874_v10 }
 0x1c7   : > { %v2046_v48 = vpop.eup %2045  ;;  %v1038_v47 = vadd.f32 1.0, %v2044_v16  ;;  %2065 = vpow2.f32 %v1707_v5  ;;  %v1295_v5 = vld [vmem:[%s2514_s26 + $0x68] sm:$0xff] }
 0x1c8   : > { %v2048_v50 = vpop.eup %2047  ;;  %2067 = vrcp.f32 %v1243_v9  ;;  %v1308_v44 = vmul.f32 %v2046_v48, %v1292_v61 }
 0x1c9   : > { %v2050_v33 = vpop.eup %2049  ;;  %2069 = vrcp.f32 %v1038_v47 }
 0x1ca   : > { %v2052_v42 = vpop.eup %2051  ;;  %2071 = vtanh.f32 %v2826_v57  ;;  %v1309_v15 = vmul.f32 %v2050_v33, %v1293_v7 }
 0x1cb   : > { %v2054_v54 = vpop.eup %2053  ;;  %v1134_v52 = vadd.f32 1.0, %v2052_v42  ;;  %2073 = vpow2.f32 %v1708_v49 }
 0x1cc   : > { %v2056_v59 = vpop.eup %2055  ;;  %2075 = vpow2.f32 %v1679_v55 }
 0x1cd   : > { %v2058_v63 = vpop.eup %2057  ;;  %v1370_v30 = vmul.f32 %v2056_v59, %v2054_v54  ;;  %2077 = vrcp.f32 %v1134_v52  ;;  %v1296_v54 = vld [vmem:[%s2514_s26 + $0x70] sm:$0xff] }
 0x1ce   : > { %v2060_v23 = vpop.eup %2059  ;;  %v1039_v2 = vadd.f32 1.0, %v2058_v63  ;;  %2079 = vpow2.f32 %v1695_v17 }
 0x1cf   : > { %v2062_v57 = vpop.eup %2061  ;;  %1386 = vst [vmem:[%s2812_s9 + $0x40] sm:$0xff] %v1370_v30  ;;  %2081 = vpow2.f32 %v1680_v56  ;;  %v1297_v56 = vld [vmem:[%s2514_s26 + $0x78] sm:$0xff] }
 0x1d0   : > { %v2064_v3 = vpop.eup %2063  ;;  %2083 = vrcp.f32 %v1039_v2  ;;  %v1135_v46 = vadd.f32 1.0, %v2062_v57 }
 0x1d1   : > { %v2066_v36 = vpop.eup %2065  ;;  %v1324_v28 = vmul.f32 %v2064_v3, %v2040_v12  ;;  %2085 = vpow2.f32 %v1696_v35 }
 0x1d2   : > { %v2068_v11 = vpop.eup %2067  ;;  %2087 = vrcp.f32 %v1135_v46  ;;  %v1244_v62 = vadd.f32 1.0, %v2066_v36 }
 0x1d3   : > { %v2070_v14 = vpop.eup %2069  ;;  %v1371_v18 = vmul.f32 %v2068_v11, %v2060_v23  ;;  %v1340_v20 = vadd.f32 %v1324_v28, %v1308_v44  ;;  %2089 = vtanh.f32 %v2842_v19 }
 0x1d4   : > { %v2072_v13 = vpop.eup %2071  ;;  %2091 = vrcp.f32 %v1244_v62 }
 0x1d5   : > { %v2074_v21 = vpop.eup %2073  ;;  %1387 = vst [vmem:[%s2812_s9 + $0x48] sm:$0xff] %v1371_v18  ;;  %2093 = vtanh.f32 %v1340_v20  ;;  %1404 = vst [vmem:[%s2774_s11 + $0x50] sm:$0xff] %v1340_v20  ;;  %v1325_v6 = vmul.f32 %v2072_v13, %v2048_v50 }
 0x1d6   : > { %v2076_v40 = vpop.eup %2075  ;;  %v1245_v22 = vadd.f32 1.0, %v2074_v21  ;;  %2095 = vpow2.f32 %v1709_v51 }
 0x1d7   : > { %v2078_v24 = vpop.eup %2077  ;;  %v1341_v25 = vadd.f32 %v1325_v6, %v1309_v15  ;;  %v1040_v58 = vadd.f32 1.0, %v2076_v40  ;;  %2097 = vtanh.f32 %v2849_v31  ;;  %v1711_v31 = vmul.f32 -1.442695, %v2868_v53 }
 0x1d8   : > { %v2080_v32 = vpop.eup %2079  ;;  %2099 = vrcp.f32 %v1245_v22  ;;  %v1310_v39 = vmul.f32 %v2078_v24, %v1294_v26 }
 0x1d9   : > { %v2082_v19 = vpop.eup %2081  ;;  %2101 = vtanh.f32 %v1341_v25  ;;  %1405 = vst [vmem:[%s2774_s11 + $0x58] sm:$0xff] %v1341_v25  ;;  %v1136_v27 = vadd.f32 1.0, %v2080_v32 }
 0x1da   : > { %v2084_v29 = vpop.eup %2083  ;;  %2103 = vrcp.f32 %v1040_v58  ;;  %v1041_v0 = vadd.f32 1.0, %v2082_v19 }
 0x1db   : > { %v2086_v34 = vpop.eup %2085  ;;  %2105 = vrcp.f32 %v1136_v27 }
 0x1dc   : > { %v2088_v8 = vpop.eup %2087  ;;  %2107 = vrcp.f32 %v1041_v0  ;;  %v1137_v37 = vadd.f32 1.0, %v2086_v34 }
 0x1dd   : > { %v2090_v43 = vpop.eup %2089  ;;  %2109 = vpow2.f32 %v1710_v1  ;;  %v1311_v9 = vmul.f32 %v2088_v8, %v1295_v5 }
 0x1de   : > { %v2092_v12 = vpop.eup %2091  ;;  %2111 = vrcp.f32 %v1137_v37  ;;  %v1326_v45 = vmul.f32 %v2090_v43, %v2070_v14 }
 0x1df   : > { %v2094_v38 = vpop.eup %2093  ;;  %2113 = vtanh.f32 %v2865_v60 }
 0x1e0   : > { %v2096_v16 = vpop.eup %2095  ;;  %v1372_v48 = vmul.f32 %v2094_v38, %v2092_v12  ;;  %v1342_v47 = vadd.f32 %v1326_v45, %v1310_v39  ;;  %2115 = vpow2.f32 %v1711_v31 }
 0x1e1   : > { %v2098_v53 = vpop.eup %2097  ;;  %v1246_v49 = vadd.f32 1.0, %v2096_v16  ;;  %2117 = vtanh.f32 %v2871_v4 }
 0x1e2   : > { %v2100_v50 = vpop.eup %2099  ;;  %1388 = vst [vmem:[%s2812_s9 + $0x50] sm:$0xff] %v1372_v48  ;;  %2119 = vtanh.f32 %v1342_v47  ;;  %1406 = vst [vmem:[%s2774_s11 + $0x60] sm:$0xff] %v1342_v47  ;;  %v1327_v60 = vmul.f32 %v2098_v53, %v2084_v29 }
 0x1e3   : > { %v2102_v55 = vpop.eup %2101  ;;  %2121 = vrcp.f32 %v1246_v49 }
 0x1e4   : > { %v2104_v10 = vpop.eup %2103  ;;  %v1373_v33 = vmul.f32 %v2102_v55, %v2100_v50  ;;  %v1343_v42 = vadd.f32 %v1327_v60, %v1311_v9  ;;  %2123 = vpow2.f32 %v1712_v41 }
 0x1e5   : > { %v2106_v17 = vpop.eup %2105 }
 0x1e6   : > { %v2108_v52 = vpop.eup %2107  ;;  %1389 = vst [vmem:[%s2812_s9 + $0x58] sm:$0xff] %v1373_v33  ;;  %1407 = vst [vmem:[%s2774_s11 + $0x68] sm:$0xff] %v1343_v42  ;;  %v1312_v61 = vmul.f32 %v2106_v17, %v1296_v54  ;;  %2125 = vtanh.f32 %v1343_v42 }
 0x1e7   : > { %v2110_v4 = vpop.eup %2109 }
 0x1e8   : > { %v2112_v59 = vpop.eup %2111  ;;  %v1247_v63 = vadd.f32 1.0, %v2110_v4 }
 0x1e9   : > { %v2114_v30 = vpop.eup %2113  ;;  %v1313_v23 = vmul.f32 %v2112_v59, %v1297_v56 }
 0x1ea   : > { %v2116_v35 = vpop.eup %2115  ;;  %2127 = vrcp.f32 %v1247_v63  ;;  %v1328_v2 = vmul.f32 %v2114_v30, %v2104_v10 }
 0x1eb   : > { %v2118_v57 = vpop.eup %2117  ;;  %v1248_v44 = vadd.f32 1.0, %v2116_v35 }
 0x1ec   : > { %v2120_v3 = vpop.eup %2119  ;;  %v1344_v7 = vadd.f32 %v1328_v2, %v1312_v61  ;;  %v1329_v46 = vmul.f32 %v2118_v57, %v2108_v52 }
 0x1ed   : > { %v2122_v36 = vpop.eup %2121  ;;  %2129 = vrcp.f32 %v1248_v44 }
 0x1ee   : > { %v2124_v28 = vpop.eup %2123  ;;  %v1374_v11 = vmul.f32 %v2122_v36, %v2120_v3  ;;  %2131 = vtanh.f32 %v1344_v7  ;;  %1408 = vst [vmem:[%s2774_s11 + $0x70] sm:$0xff] %v1344_v7  ;;  %v1345_v62 = vadd.f32 %v1329_v46, %v1313_v23 }
 0x1ef   : > { %v1249_v51 = vadd.f32 1.0, %v2124_v28 }
 0x1f0   : > { %1390 = vst [vmem:[%s2812_s9 + $0x60] sm:$0xff] %v1374_v11  ;;  %2133 = vtanh.f32 %v1345_v62  ;;  %1409 = vst [vmem:[%s2774_s11 + $0x78] sm:$0xff] %v1345_v62 }
 0x1f1   : > { %2135 = vrcp.f32 %v1249_v51 }
 0x1f2   : > { %2210 = shalt.err (!%p2207_p3)
}
 0x1f3   : > { %s2211_s28 = scalar_lea.hbm %s2940_s17, 2048  ;;  %s2215_s11 = scalar_lea.hbm %s3037_s5, 4096 }
 0x1f4   : > { %p2212_p8 = scmp.ne.s32.totalorder %s2940_s17, %s2211_s28  ;;  %p2216_p4 = scmp.lt.u32.totalorder %s2940_s17, %s3037_s5 }
 0x1f5   : > { %p2217_p6 = scmp.lt.u32.totalorder %s2215_s11, %s2211_s28  ;;  %p2219_p1 = scmp.lt.u32.totalorder %s2211_s28, %s2940_s17 }
 0x1f6   : > { %p2213_p0 = pnand %p2212_p8, %p3049_p12 }
 0x1f7   : > { %p2218_p13 = por %p2217_p6, %p2216_p4 }
 0x1f8   : > { %p2214_p2 = pneg %p2213_p0 }
 0x1f9   : > { %p2220_p10 = por %p2219_p1, %p2218_p13 }
 0x1fb   : > { %p2221_p5 = pnand %p2220_p10, %p2214_p2 }
 0x1fd   : > { %2224 = shalt.err (!%p2221_p5)
}
 0x1fe   : > { %s2306_s14 = smov 128   ;;  %s2307_s23 = smov 8   ;;  %v2126_v14 = vpop.eup %2125 }
 0x1ff   : > { %1730 = dma.vmem_to_hbm [thread:$0]  (%p3049_p12), %s2943_s12, 2048, %s2940_s17, %s1416_s29, %s2306_s14, %s2306_s14, %s2307_s23   ;;  %v2128_v15 = vpop.eup %2127 }
 0x200   : > { %v1375_v18 = vmul.f32 %v2128_v15, %v2126_v14  ;;  %v2130_v20 = vpop.eup %2129  ;;  %s1429_s15 = sshll.u32 %s2812_s9, 4  ;;  %s2982_s13 = scalar_lea.hbm %s3036_s4, %s1723_s8  ;;  %s2984_s15 = int_to_ptr.vmem [resolvable:$true] %s1429_s15 }
 0x201   : > { %v2132_v13 = vpop.eup %2131  ;;  %s1411_s12 = scalar_lea.sflag [#allocation4], %s2499_s10  ;;  %s2225_s17 = scalar_lea.vmem %s2984_s15, 2048 }
 0x202   : > { %1391 = vst [vmem:[%s2812_s9 + $0x68] sm:$0xff] %v1375_v18  ;;  %v1376_v21 = vmul.f32 %v2132_v13, %v2130_v20  ;;  %v2134_v6 = vpop.eup %2133  ;;  %p2226_p7 = scmp.ne.s32.totalorder %s2984_s15, %s2225_s17  ;;  %s2308_s29 = smov [#allocation7]  }
 0x203   : > { %v2136_v40 = vpop.eup %2135  ;;  %s2229_s25 = sshll.u32 %s2308_s29, 4  ;;  %s2230_s25 = int_to_ptr.vmem [resolvable:$false] %s2229_s25 }
 0x204   : > { %1392 = vst [vmem:[%s2812_s9 + $0x70] sm:$0xff] %v1376_v21  ;;  %v1377_v22 = vmul.f32 %v2136_v40, %v2134_v6  ;;  %p2227_p9 = pnand %p2226_p7, %p3049_p12  ;;  %s2231_s22 = scalar_lea.vmem %s2230_s25, 4096 }
 0x205   : > { %p2232_p3 = scmp.lt.s32.totalorder %s2984_s15, %s2230_s25  ;;  %p2233_p8 = scmp.lt.s32.totalorder %s2231_s22, %s2225_s17 }
 0x206   : > { %1393 = vst [vmem:[%s2812_s9 + $0x78] sm:$0xff] %v1377_v22  ;;  %p2228_p11 = pneg %p2227_p9 }
 0x207   : > { %p2234_p0 = por %p2233_p8, %p2232_p3 }
 0x209   : > { %p2235_p2 = pnand %p2234_p0, %p2228_p11 }
 0x20b   : > { %2238 = shalt.err (!%p2235_p2)
}
 0x20c   : > { %s2239_s9 = scalar_lea.hbm %s2982_s13, 2048  ;;  %s2243_s26 = scalar_lea.hbm %s3036_s4, 4096 }
 0x20d   : > { %p2240_p4 = scmp.ne.s32.totalorder %s2982_s13, %s2239_s9  ;;  %p2244_p1 = scmp.lt.u32.totalorder %s2982_s13, %s3036_s4 }
 0x20e   : > { %p2245_p10 = scmp.lt.u32.totalorder %s2243_s26, %s2239_s9  ;;  %p2247_p7 = scmp.lt.u32.totalorder %s2239_s9, %s2982_s13 }
 0x20f   : > { %p2241_p6 = pnand %p2240_p4, %p3049_p12 }
 0x210   : > { %p2246_p5 = por %p2245_p10, %p2244_p1 }
 0x211   : > { %p2242_p13 = pneg %p2241_p6 }
 0x212   : > { %p2248_p9 = por %p2247_p7, %p2246_p5 }
 0x214   : > { %p2249_p11 = pnand %p2248_p9, %p2242_p13 }
 0x216   : > { %2252 = shalt.err (!%p2249_p11)
}
 0x217   : > { %1729 = dma.vmem_to_hbm [thread:$0]  (%p3049_p12), %s2984_s15, 2048, %s2982_s13, %s1411_s12, %s2306_s14, %s2306_s14, %s2307_s23  }
 0x218 PF: > { %s1460_s28 = sand.u32 1, %s2287_s18   ;;  %p3050_p3 = scmp.ne.s32.totalorder %s3044_s6, 0 }
 0x219   : > { %p3051_p8 = scmp.ge.s32.totalorder %s2299_s21, 2  ;;  %s1461_s17 = scalar_lea.sflag [#allocation4], %s1460_s28 }
 0x21b   : > { %p1741_p0 = pnand %p3051_p8, %p3050_p3 }
 0x21d   : > { %2278 = dma.done.wait (!%p1741_p0), %s1461_s17, 2048  }
 0x21e   : > { %2280 = vsyncadd (!%p1741_p0), %s1461_s17, 4294965248  ;;  %s1470_s30 = scalar_lea.sflag [#allocation9], %s1460_s28 }
 0x21f   : > { %2282 = dma.done.wait (!%p1741_p0), %s1470_s30, 2048  }
 0x220   : > { %2284 = vsyncadd (!%p1741_p0), %s1470_s30, 4294965248  ;;  %p25_p12 = scmp.ge.s32.totalorder %s2364_s24, 4   ;;  %s3052_s18 = smov %s2291_s19 }
 0x221   : > { %s3053_s19 = smov %s2295_s20  ;;  %s3054_s20 = smov %s2376_s27 }
 0x222   : > { %s3055_s21 = smov %s2364_s24  ;;  %27 = sbr.rel (!%p25_p12) target bundleno = 9 (0x9), region = 114 }
 0x229   :  { %1475 = vsyncpa [#allocation3], 1 }
 0x22a   :  { %1477 = vsyncpa [#allocation3 + $0x1], 1 }
 0x22b   :  { %1478 = vsyncpa [#allocation6], 1 }
 0x22c   :  { %1480 = vsyncpa [#allocation6 + $0x1], 1 }
 0x22d   :  { %1481 = vsyncpa [#allocation4], 1 }
 0x22e   :  { %1483 = vsyncpa [#allocation4 + $0x1], 1 }
 0x22f   :  { %1484 = vsyncpa [#allocation9], 1 }
 0x230   :  { %1486 = vsyncpa [#allocation9 + $0x1], 1 }

</bundles_post_ra>
